<compile_context>
chip_gen: v7x
topology: tpu7x:2x2x1
jax: 0.10.0
libtpu: 0.0.40
codegen_flags: <defaults>
</compile_context>

<pallas_src>
import functools
import math

import jax
import jax.numpy as jnp
from jax import lax
from jax.experimental import pallas as pl
from jax.experimental.pallas import tpu as pltpu


def _attn_kernel(h_ref, wqkv_ref, bqkv_ref, wo_ref, bo_ref, o_ref,
                 qkv_ref, ctx_ref, *, num_heads, head_dim, seq_real, head_group):
    """One batch block per grid step.

    h_ref    : (Bb, S_pad, H)      activations
    wqkv_ref : (H, 3H)             fused q|k|v weights (bf16, q pre-scaled)
    bqkv_ref : (1, 3H)             fused biases (f32, q-bias pre-scaled)
    wo_ref   : (H, H)              output-projection weights (bf16)
    bo_ref   : (1, H)              output-projection bias (f32)
    o_ref    : (Bb, S_pad, H)      attention output
    qkv_ref  : (Bb*S_pad, 3H) bf16 VMEM scratch (fused QKV projection)
    ctx_ref  : (Bb*S_pad, H)  bf16 VMEM scratch (per-head context, lane-packed)
    """
    Bb, S, H = h_ref.shape

    # ---- 1. Fused QKV projection: one wide (Bb*S, H) @ (H, 3H) MXU matmul. ----
    h = h_ref[...].reshape(Bb * S, H).astype(jnp.bfloat16)
    qkv = jnp.dot(h, wqkv_ref[...], preferred_element_type=jnp.float32)
    qkv = qkv + bqkv_ref[...]                       # (Bb*S, 3H) f32
    qkv_ref[...] = qkv.astype(jnp.bfloat16)         # park in scratch; f32 value dies

    # Key-padding bias, only materialized when S was padded (kept in f32).
    if seq_real < S:
        kidx = lax.broadcasted_iota(jnp.int32, (1, S), 1)
        key_bias = jnp.where(kidx < seq_real, 0.0, -1e30).astype(jnp.float32)
    else:
        key_bias = None

    dn_qk = (((1,), (1,)), ((), ()))     # q @ k^T by contracting last dims (no transpose)
    row_align = S & (-S)                 # S is a multiple of 16
    n_groups = num_heads // head_group
    group_width = head_group * head_dim

    # ---- 2. Per-batch attention; heads unrolled (static lane offsets). ----
    @pl.loop(0, Bb)
    def _(b):
        r0 = pl.multiple_of(b * S, row_align)
        for g in range(n_groups):
            ctx_parts = []
            for hh in range(g * head_group, (g + 1) * head_group):
                c0 = hh * head_dim
                q = qkv_ref[pl.ds(r0, S), c0:c0 + head_dim]
                k = qkv_ref[pl.ds(r0, S), H + c0:H + c0 + head_dim]
                v = qkv_ref[pl.ds(r0, S), 2 * H + c0:2 * H + c0 + head_dim]

                # scores (1/sqrt(d) already folded into the q projection weights)
                s = lax.dot_general(q, k, dn_qk,
                                    preferred_element_type=jnp.float32)   # (S, S)
                if key_bias is not None:
                    s = s + key_bias

                # softmax in f32; approx reciprocal goes to the EUP slot
                m = jnp.max(s, axis=-1, keepdims=True)
                e = jnp.exp(s - m)
                p = e * pl.reciprocal(jnp.sum(e, axis=-1, keepdims=True), approx=True)

                ctx = jnp.dot(p.astype(jnp.bfloat16), v,
                              preferred_element_type=jnp.float32)          # (S, d)
                ctx_parts.append(ctx.astype(jnp.bfloat16))

            ctx_g = ctx_parts[0] if head_group == 1 else jnp.concatenate(
                ctx_parts, axis=-1)                                        # (S, gw)
            c_lo = g * group_width
            ctx_ref[pl.ds(r0, S), c_lo:c_lo + group_width] = ctx_g

    # ---- 3. One output projection with full K = H contraction + bias. ----
    out = jnp.dot(ctx_ref[...], wo_ref[...], preferred_element_type=jnp.float32)
    out = out + bo_ref[...]
    o_ref[...] = out.reshape(Bb, S, H).astype(o_ref.dtype)


def _vmem_capacity_bytes():
    """Generation-aware VMEM capacity (v5e/v6e: 128 MiB, v7x: 64 MiB)."""
    try:
        info = pltpu.get_tpu_info()
        cap = getattr(info, "vmem_capacity_bytes", None)
        if cap:
            return int(cap)
    except Exception:
        pass
    return 64 * 1024 * 1024   # v7x-safe fallback


def _pick_batch_block(B, S_pad, H, vmem_bytes):
    """Pick batch_block and an explicit vmem_limit from a real VMEM accounting."""
    # Per batch element in the block (bytes):
    #   f32 in/out blocks, double-buffered : 2*(4+4)*S*H = 16*S*H
    #   qkv bf16 scratch (S,3H) + ctx (S,H):           8*S*H
    #   transient f32 qkv + f32 out values :          16*S*H
    per_b = 40 * S_pad * H
    # Resident weights (bf16, counted x2 for the pipeline buffer pair) plus
    # per-head f32 transients (scores/exp/probs) and slack.
    fixed = 2 * (8 * H * H) + 16 * S_pad * S_pad + (2 << 20)
    budget = int(0.7 * vmem_bytes)

    max_bb = B // 2 if B > 1 else 1     # >= 2 grid steps so v7x's 2 TCs both work
    bb = 1
    for cand in range(max_bb, 0, -1):
        if B % cand == 0 and fixed + cand * per_b <= budget:
            bb = cand
            break
    required = fixed + bb * per_b
    vmem_limit = int(min(0.9 * vmem_bytes, max(32 << 20, 2 * required)))
    return bb, vmem_limit


def vit_attention_memory(hidden_states, wq, bq, wk, bk, wv, bv, wo, bo,
                         num_heads, batch_block=None):
    """ViTAttentionMemory forward (eval, not mem_min_full): SelfAttention + SelfOutput.

    hidden_states: (B, S, H); weights (H, H) pre-transposed; biases (H,).
    """
    B, S, H = hidden_states.shape
    head_dim = H // num_heads
    scale = 1.0 / math.sqrt(head_dim)

    # Pad S to a multiple of 16 (bf16 sublane tile); pad keys are masked.
    S_pad = ((S + 15) // 16) * 16
    if S_pad != S:
        hidden_states = jnp.pad(hidden_states, ((0, 0), (0, S_pad - S), (0, 0)))

    # Fused QKV; fold 1/sqrt(d) into the query projection; bf16 weights for MXU.
    wqkv = jnp.concatenate([wq * scale, wk, wv], axis=1).astype(jnp.bfloat16)
    bqkv = jnp.concatenate([bq * scale, bk, bv]).reshape(1, 3 * H).astype(jnp.float32)
    wo_b = wo.astype(jnp.bfloat16)
    bo2 = bo.reshape(1, H).astype(jnp.float32)

    vmem_bytes = _vmem_capacity_bytes()
    auto_bb, vmem_limit = _pick_batch_block(B, S_pad, H, vmem_bytes)
    if batch_block is None:
        batch_block = auto_bb
    assert B % batch_block == 0
    grid = (B // batch_block,)

    # Group heads so each ctx store is the widest lane slab not exceeding 128
    # lanes (e.g. pairs of 64-wide heads on ViT-Base): dense, aligned stores
    # while only head_group contexts stay live at once.
    head_group = 1
    while (head_group * 2 <= num_heads and num_heads % (head_group * 2) == 0
           and head_group * 2 * head_dim <= 128):
        head_group *= 2

    kernel = functools.partial(_attn_kernel, num_heads=num_heads,
                               head_dim=head_dim, seq_real=S,
                               head_group=head_group)

    flops = B * (2 * S_pad * H * 3 * H                       # fused QKV matmul
                 + 4 * num_heads * S_pad * S_pad * head_dim  # q@k^T and p@v
                 + 2 * S_pad * H * H)                        # output projection
    itemsize = jnp.dtype(hidden_states.dtype).itemsize
    cost = pl.CostEstimate(
        flops=int(flops),
        transcendentals=int(B * num_heads * S_pad * S_pad),
        bytes_accessed=int(2 * B * S_pad * H * itemsize
                           + wqkv.size * 2 + wo_b.size * 2
                           + bqkv.size * 4 + bo2.size * 4),
    )

    out = pl.pallas_call(
        kernel,
        out_shape=jax.ShapeDtypeStruct((B, S_pad, H), hidden_states.dtype),
        grid_spec=pltpu.PrefetchScalarGridSpec(
            num_scalar_prefetch=0,
            grid=grid,
            in_specs=[
                pl.BlockSpec((batch_block, S_pad, H), lambda i: (i, 0, 0)),  # hidden
                # Weight/bias index_maps are constant -> no per-step re-DMA
                # (their buffer pair is counted x2 in the VMEM budget).
                pl.BlockSpec((H, 3 * H), lambda i: (0, 0)),                  # wqkv
                pl.BlockSpec((1, 3 * H), lambda i: (0, 0)),                  # bqkv
                pl.BlockSpec((H, H), lambda i: (0, 0)),                      # wo
                pl.BlockSpec((1, H), lambda i: (0, 0)),                      # bo
            ],
            out_specs=pl.BlockSpec((batch_block, S_pad, H), lambda i: (i, 0, 0)),
            scratch_shapes=[
                pltpu.VMEM((batch_block * S_pad, 3 * H), jnp.bfloat16),  # qkv
                pltpu.VMEM((batch_block * S_pad, H), jnp.bfloat16),      # ctx
            ],
        ),
        compiler_params=pltpu.CompilerParams(
            dimension_semantics=("parallel",),
            vmem_limit_bytes=vmem_limit,
        ),
        cost_estimate=cost,
    )(hidden_states, wqkv, bqkv, wo_b, bo2)

    return out[:, :S, :] if S_pad != S else out


def _reference(hidden_states, wq, bq, wk, bk, wv, bv, wo, bo, num_heads):
    """Pure-JAX f32 reference matching the PyTorch forward."""
    B, S, H = hidden_states.shape
    d = H // num_heads
    q = hidden_states @ wq + bq
    k = hidden_states @ wk + bk
    v = hidden_states @ wv + bv

    def split(x):
        return x.reshape(B, S, num_heads, d).transpose(0, 2, 1, 3)

    qh, kh, vh = split(q), split(k), split(v)
    scores = jnp.einsum('bhqd,bhkd->bhqk', qh, kh) / math.sqrt(d)
    probs = jax.nn.softmax(scores, axis=-1)
    ctx = jnp.einsum('bhqk,bhkd->bhqd', probs, vh)
    ctx = ctx.transpose(0, 2, 1, 3).reshape(B, S, H)
    return ctx @ wo + bo


if __name__ == "__main__":
    num_heads = 4
    H = 32
    key = jax.random.PRNGKey(0)
    keys = jax.random.split(key, 11)
    wscale = 1.0 / math.sqrt(H)

    # nn.Linear weights (out, in) -> stored transposed (in, out); qkv_bias=True.
    wq = jax.random.uniform(keys[1], (H, H), jnp.float32, -wscale, wscale)
    wk = jax.random.uniform(keys[2], (H, H), jnp.float32, -wscale, wscale)
    wv = jax.random.uniform(keys[3], (H, H), jnp.float32, -wscale, wscale)
    wo = jax.random.uniform(keys[4], (H, H), jnp.float32, -wscale, wscale)
    bq = jax.random.uniform(keys[5], (H,), jnp.float32, -wscale, wscale)
    bk = jax.random.uniform(keys[6], (H,), jnp.float32, -wscale, wscale)
    bv = jax.random.uniform(keys[7], (H,), jnp.float32, -wscale, wscale)
    bo = jax.random.uniform(keys[8], (H,), jnp.float32, -wscale, wscale)

    # Test 1: aligned sequence (B=2, S=16, H=32, heads=4).
    B, S = 2, 16
    hidden = jax.random.normal(keys[0], (B, S, H), dtype=jnp.float32)
    out = jax.block_until_ready(
        vit_attention_memory(hidden, wq, bq, wk, bk, wv, bv, wo, bo, num_heads))
    ref = _reference(hidden, wq, bq, wk, bk, wv, bv, wo, bo, num_heads)
    assert out.shape == (B, S, H)
    assert jnp.allclose(out, ref, atol=3e-2, rtol=3e-2), \
        f"max err {jnp.max(jnp.abs(out - ref))}"

    # Test 2: unaligned sequence (B=2, S=10) -> padding + key-masking path.
    B2, S2 = 2, 10
    hidden2 = jax.random.normal(keys[9], (B2, S2, H), dtype=jnp.float32)
    out2 = jax.block_until_ready(
        vit_attention_memory(hidden2, wq, bq, wk, bk, wv, bv, wo, bo, num_heads))
    ref2 = _reference(hidden2, wq, bq, wk, bk, wv, bv, wo, bo, num_heads)
    assert out2.shape == (B2, S2, H)
    assert jnp.allclose(out2, ref2, atol=3e-2, rtol=3e-2), \
        f"max err {jnp.max(jnp.abs(out2 - ref2))}"

    print("KERNEL_OK")
</pallas_src>

<mosaic_0001>
module attributes {stable_mosaic.version = 11 : i64} {
  func.func @_attn_kernel(%arg0: i32, %arg1: memref<1x16x32xf32, #tpu.memory_space<vmem>>, %arg2: memref<32x96xbf16, #tpu.memory_space<vmem>>, %arg3: memref<1x96xf32, #tpu.memory_space<vmem>>, %arg4: memref<32x32xbf16, #tpu.memory_space<vmem>>, %arg5: memref<1x32xf32, #tpu.memory_space<vmem>>, %arg6: memref<1x16x32xf32, #tpu.memory_space<vmem>>, %arg7: memref<16x96xbf16, #tpu.memory_space<vmem>>, %arg8: memref<16x32xbf16, #tpu.memory_space<vmem>>) attributes {dimension_semantics = [#tpu.dimension_semantics<parallel>], iteration_bounds = array<i64: 2>, scalar_prefetch = 0 : i64, scratch_operands = 2 : i64, tpu.core_type = #tpu.core_type<tc>, window_params = [{transform_indices = @transform_0, window_bounds = array<i64: 1, 16, 32>}, {pipeline_mode = #tpu.pipeline_mode<synchronous>, transform_indices = @transform_1, window_bounds = array<i64: 32, 96>}, {pipeline_mode = #tpu.pipeline_mode<synchronous>, transform_indices = @transform_2, window_bounds = array<i64: 1, 96>}, {pipeline_mode = #tpu.pipeline_mode<synchronous>, transform_indices = @transform_3, window_bounds = array<i64: 32, 32>}, {pipeline_mode = #tpu.pipeline_mode<synchronous>, transform_indices = @transform_4, window_bounds = array<i64: 1, 32>}, {transform_indices = @transform_5, window_bounds = array<i64: 1, 16, 32>}]} {
    %c0 = arith.constant 0 : index
    %c0_0 = arith.constant 0 : index
    %c0_1 = arith.constant 0 : index
    %0 = vector.load %arg1[%c0, %c0_0, %c0_1] : memref<1x16x32xf32, #tpu.memory_space<vmem>>, vector<1x16x32xf32>
    %1 = vector.shape_cast %0 : vector<1x16x32xf32> to vector<16x32xf32>
    %2 = arith.truncf %1 : vector<16x32xf32> to vector<16x32xbf16>
    %c0_2 = arith.constant 0 : index
    %c0_3 = arith.constant 0 : index
    %3 = vector.load %arg2[%c0_2, %c0_3] : memref<32x96xbf16, #tpu.memory_space<vmem>>, vector<32x96xbf16>
    %cst = arith.constant dense<0.000000e+00> : vector<16x96xf32>
    %4 = tpu.matmul %2, %3, %cst {dimension_numbers = #tpu.dot_dimension_numbers<[1], [0], [0], [1], [0, 0, 1, 1], [], []>} : vector<16x32xbf16>, vector<32x96xbf16>, vector<16x96xf32> -> vector<16x96xf32>
    %c0_4 = arith.constant 0 : index
    %c0_5 = arith.constant 0 : index
    %5 = vector.load %arg3[%c0_4, %c0_5] : memref<1x96xf32, #tpu.memory_space<vmem>>, vector<1x96xf32>
    %6 = vector.broadcast %5 : vector<1x96xf32> to vector<16x96xf32>
    %7 = arith.addf %4, %6 : vector<16x96xf32>
    %8 = arith.truncf %7 : vector<16x96xf32> to vector<16x96xbf16>
    %c0_6 = arith.constant 0 : index
    %c0_7 = arith.constant 0 : index
    %9 = vector.load %arg7[%c0_6, %c0_7] : memref<16x96xbf16, #tpu.memory_space<vmem>>, vector<16x96xbf16>
    tpu.vector_store %arg7[%c0_6, %c0_7], %8 {strides = array<i32>} : memref<16x96xbf16, #tpu.memory_space<vmem>>, vector<16x96xbf16>,
    %c0_i32 = arith.constant 0 : i32
    %c1_i32 = arith.constant 1 : i32
    %10 = arith.muli %c0_i32, %c1_i32 : i32
    %c0_i32_8 = arith.constant 0 : i32
    %11 = arith.addi %c0_i32_8, %10 : i32
    %c16_i32 = arith.constant 16 : i32
    %12 = arith.muli %11, %c16_i32 : i32
    %13 = tpu.assume_multiple %12, 16 : i32
    %14 = arith.index_cast %13 : i32 to index
    %c0_9 = arith.constant 0 : index
    %15 = vector.load %arg7[%14, %c0_9] : memref<16x96xbf16, #tpu.memory_space<vmem>>, vector<16x8xbf16>
    %16 = arith.index_cast %13 : i32 to index
    %c32 = arith.constant 32 : index
    %17 = vector.load %arg7[%16, %c32] : memref<16x96xbf16, #tpu.memory_space<vmem>>, vector<16x8xbf16>
    %18 = arith.index_cast %13 : i32 to index
    %c64 = arith.constant 64 : index
    %19 = vector.load %arg7[%18, %c64] : memref<16x96xbf16, #tpu.memory_space<vmem>>, vector<16x8xbf16>
    %cst_10 = arith.constant dense<0.000000e+00> : vector<16x16xf32>
    %20 = tpu.matmul %15, %17, %cst_10 {dimension_numbers = #tpu.dot_dimension_numbers<[1], [1], [0], [0], [0, 0, 1, 0], [], []>} : vector<16x8xbf16>, vector<16x8xbf16>, vector<16x16xf32> -> vector<16x16xf32>
    %cst_11 = arith.constant dense<0xFF800000> : vector<16xf32>
    %21 = vector.multi_reduction <maximumf>, %20, %cst_11 [1] : vector<16x16xf32> to vector<16xf32>
    %22 = vector.shape_cast %21 : vector<16xf32> to vector<16x1xf32>
    %23 = vector.broadcast %22 : vector<16x1xf32> to vector<16x16xf32>
    %24 = arith.subf %20, %23 : vector<16x16xf32>
    %25 = math.exp %24 : vector<16x16xf32>
    %cst_12 = arith.constant dense<0.000000e+00> : vector<16xf32>
    %26 = vector.multi_reduction <add>, %25, %cst_12 [1] : vector<16x16xf32> to vector<16xf32>
    %27 = vector.shape_cast %26 : vector<16xf32> to vector<16x1xf32>
    %28 = tpu.reciprocal %27 {approx = true} : vector<16x1xf32> -> vector<16x1xf32>
    %29 = vector.broadcast %28 : vector<16x1xf32> to vector<16x16xf32>
    %30 = arith.mulf %25, %29 : vector<16x16xf32>
    %31 = arith.truncf %30 : vector<16x16xf32> to vector<16x16xbf16>
    %cst_13 = arith.constant dense<0.000000e+00> : vector<16x8xf32>
    %32 = tpu.matmul %31, %19, %cst_13 {dimension_numbers = #tpu.dot_dimension_numbers<[1], [0], [0], [1], [0, 0, 1, 1], [], []>} : vector<16x16xbf16>, vector<16x8xbf16>, vector<16x8xf32> -> vector<16x8xf32>
    %33 = arith.truncf %32 : vector<16x8xf32> to vector<16x8xbf16>
    %34 = arith.index_cast %13 : i32 to index
    %c8 = arith.constant 8 : index
    %35 = vector.load %arg7[%34, %c8] : memref<16x96xbf16, #tpu.memory_space<vmem>>, vector<16x8xbf16>
    %36 = arith.index_cast %13 : i32 to index
    %c40 = arith.constant 40 : index
    %37 = vector.load %arg7[%36, %c40] : memref<16x96xbf16, #tpu.memory_space<vmem>>, vector<16x8xbf16>
    %38 = arith.index_cast %13 : i32 to index
    %c72 = arith.constant 72 : index
    %39 = vector.load %arg7[%38, %c72] : memref<16x96xbf16, #tpu.memory_space<vmem>>, vector<16x8xbf16>
    %cst_14 = arith.constant dense<0.000000e+00> : vector<16x16xf32>
    %40 = tpu.matmul %35, %37, %cst_14 {dimension_numbers = #tpu.dot_dimension_numbers<[1], [1], [0], [0], [0, 0, 1, 0], [], []>} : vector<16x8xbf16>, vector<16x8xbf16>, vector<16x16xf32> -> vector<16x16xf32>
    %cst_15 = arith.constant dense<0xFF800000> : vector<16xf32>
    %41 = vector.multi_reduction <maximumf>, %40, %cst_15 [1] : vector<16x16xf32> to vector<16xf32>
    %42 = vector.shape_cast %41 : vector<16xf32> to vector<16x1xf32>
    %43 = vector.broadcast %42 : vector<16x1xf32> to vector<16x16xf32>
    %44 = arith.subf %40, %43 : vector<16x16xf32>
    %45 = math.exp %44 : vector<16x16xf32>
    %cst_16 = arith.constant dense<0.000000e+00> : vector<16xf32>
    %46 = vector.multi_reduction <add>, %45, %cst_16 [1] : vector<16x16xf32> to vector<16xf32>
    %47 = vector.shape_cast %46 : vector<16xf32> to vector<16x1xf32>
    %48 = tpu.reciprocal %47 {approx = true} : vector<16x1xf32> -> vector<16x1xf32>
    %49 = vector.broadcast %48 : vector<16x1xf32> to vector<16x16xf32>
    %50 = arith.mulf %45, %49 : vector<16x16xf32>
    %51 = arith.truncf %50 : vector<16x16xf32> to vector<16x16xbf16>
    %cst_17 = arith.constant dense<0.000000e+00> : vector<16x8xf32>
    %52 = tpu.matmul %51, %39, %cst_17 {dimension_numbers = #tpu.dot_dimension_numbers<[1], [0], [0], [1], [0, 0, 1, 1], [], []>} : vector<16x16xbf16>, vector<16x8xbf16>, vector<16x8xf32> -> vector<16x8xf32>
    %53 = arith.truncf %52 : vector<16x8xf32> to vector<16x8xbf16>
    %54 = arith.index_cast %13 : i32 to index
    %c16 = arith.constant 16 : index
    %55 = vector.load %arg7[%54, %c16] : memref<16x96xbf16, #tpu.memory_space<vmem>>, vector<16x8xbf16>
    %56 = arith.index_cast %13 : i32 to index
    %c48 = arith.constant 48 : index
    %57 = vector.load %arg7[%56, %c48] : memref<16x96xbf16, #tpu.memory_space<vmem>>, vector<16x8xbf16>
    %58 = arith.index_cast %13 : i32 to index
    %c80 = arith.constant 80 : index
    %59 = vector.load %arg7[%58, %c80] : memref<16x96xbf16, #tpu.memory_space<vmem>>, vector<16x8xbf16>
    %cst_18 = arith.constant dense<0.000000e+00> : vector<16x16xf32>
    %60 = tpu.matmul %55, %57, %cst_18 {dimension_numbers = #tpu.dot_dimension_numbers<[1], [1], [0], [0], [0, 0, 1, 0], [], []>} : vector<16x8xbf16>, vector<16x8xbf16>, vector<16x16xf32> -> vector<16x16xf32>
    %cst_19 = arith.constant dense<0xFF800000> : vector<16xf32>
    %61 = vector.multi_reduction <maximumf>, %60, %cst_19 [1] : vector<16x16xf32> to vector<16xf32>
    %62 = vector.shape_cast %61 : vector<16xf32> to vector<16x1xf32>
    %63 = vector.broadcast %62 : vector<16x1xf32> to vector<16x16xf32>
    %64 = arith.subf %60, %63 : vector<16x16xf32>
    %65 = math.exp %64 : vector<16x16xf32>
    %cst_20 = arith.constant dense<0.000000e+00> : vector<16xf32>
    %66 = vector.multi_reduction <add>, %65, %cst_20 [1] : vector<16x16xf32> to vector<16xf32>
    %67 = vector.shape_cast %66 : vector<16xf32> to vector<16x1xf32>
    %68 = tpu.reciprocal %67 {approx = true} : vector<16x1xf32> -> vector<16x1xf32>
    %69 = vector.broadcast %68 : vector<16x1xf32> to vector<16x16xf32>
    %70 = arith.mulf %65, %69 : vector<16x16xf32>
    %71 = arith.truncf %70 : vector<16x16xf32> to vector<16x16xbf16>
    %cst_21 = arith.constant dense<0.000000e+00> : vector<16x8xf32>
    %72 = tpu.matmul %71, %59, %cst_21 {dimension_numbers = #tpu.dot_dimension_numbers<[1], [0], [0], [1], [0, 0, 1, 1], [], []>} : vector<16x16xbf16>, vector<16x8xbf16>, vector<16x8xf32> -> vector<16x8xf32>
    %73 = arith.truncf %72 : vector<16x8xf32> to vector<16x8xbf16>
    %74 = arith.index_cast %13 : i32 to index
    %c24 = arith.constant 24 : index
    %75 = vector.load %arg7[%74, %c24] : memref<16x96xbf16, #tpu.memory_space<vmem>>, vector<16x8xbf16>
    %76 = arith.index_cast %13 : i32 to index
    %c56 = arith.constant 56 : index
    %77 = vector.load %arg7[%76, %c56] : memref<16x96xbf16, #tpu.memory_space<vmem>>, vector<16x8xbf16>
    %78 = arith.index_cast %13 : i32 to index
    %c88 = arith.constant 88 : index
    %79 = vector.load %arg7[%78, %c88] : memref<16x96xbf16, #tpu.memory_space<vmem>>, vector<16x8xbf16>
    %cst_22 = arith.constant dense<0.000000e+00> : vector<16x16xf32>
    %80 = tpu.matmul %75, %77, %cst_22 {dimension_numbers = #tpu.dot_dimension_numbers<[1], [1], [0], [0], [0, 0, 1, 0], [], []>} : vector<16x8xbf16>, vector<16x8xbf16>, vector<16x16xf32> -> vector<16x16xf32>
    %cst_23 = arith.constant dense<0xFF800000> : vector<16xf32>
    %81 = vector.multi_reduction <maximumf>, %80, %cst_23 [1] : vector<16x16xf32> to vector<16xf32>
    %82 = vector.shape_cast %81 : vector<16xf32> to vector<16x1xf32>
    %83 = vector.broadcast %82 : vector<16x1xf32> to vector<16x16xf32>
    %84 = arith.subf %80, %83 : vector<16x16xf32>
    %85 = math.exp %84 : vector<16x16xf32>
    %cst_24 = arith.constant dense<0.000000e+00> : vector<16xf32>
    %86 = vector.multi_reduction <add>, %85, %cst_24 [1] : vector<16x16xf32> to vector<16xf32>
    %87 = vector.shape_cast %86 : vector<16xf32> to vector<16x1xf32>
    %88 = tpu.reciprocal %87 {approx = true} : vector<16x1xf32> -> vector<16x1xf32>
    %89 = vector.broadcast %88 : vector<16x1xf32> to vector<16x16xf32>
    %90 = arith.mulf %85, %89 : vector<16x16xf32>
    %91 = arith.truncf %90 : vector<16x16xf32> to vector<16x16xbf16>
    %cst_25 = arith.constant dense<0.000000e+00> : vector<16x8xf32>
    %92 = tpu.matmul %91, %79, %cst_25 {dimension_numbers = #tpu.dot_dimension_numbers<[1], [0], [0], [1], [0, 0, 1, 1], [], []>} : vector<16x16xbf16>, vector<16x8xbf16>, vector<16x8xf32> -> vector<16x8xf32>
    %93 = arith.truncf %92 : vector<16x8xf32> to vector<16x8xbf16>
    %94 = tpu.concatenate %33, %53, %73, %93 in 1 : vector<16x8xbf16>, vector<16x8xbf16>, vector<16x8xbf16>, vector<16x8xbf16> -> vector<16x32xbf16>
    %95 = arith.index_cast %13 : i32 to index
    %c0_26 = arith.constant 0 : index
    %96 = vector.load %arg8[%95, %c0_26] : memref<16x32xbf16, #tpu.memory_space<vmem>>, vector<16x32xbf16>
    tpu.vector_store %arg8[%95, %c0_26], %94 {strides = array<i32>} : memref<16x32xbf16, #tpu.memory_space<vmem>>, vector<16x32xbf16>,
    %c1_i32_27 = arith.constant 1 : i32
    %c0_28 = arith.constant 0 : index
    %c0_29 = arith.constant 0 : index
    %97 = vector.load %arg8[%c0_28, %c0_29] : memref<16x32xbf16, #tpu.memory_space<vmem>>, vector<16x32xbf16>
    %c0_30 = arith.constant 0 : index
    %c0_31 = arith.constant 0 : index
    %98 = vector.load %arg4[%c0_30, %c0_31] : memref<32x32xbf16, #tpu.memory_space<vmem>>, vector<32x32xbf16>
    %cst_32 = arith.constant dense<0.000000e+00> : vector<16x32xf32>
    %99 = tpu.matmul %97, %98, %cst_32 {dimension_numbers = #tpu.dot_dimension_numbers<[1], [0], [0], [1], [0, 0, 1, 1], [], []>} : vector<16x32xbf16>, vector<32x32xbf16>, vector<16x32xf32> -> vector<16x32xf32>
    %c0_33 = arith.constant 0 : index
    %c0_34 = arith.constant 0 : index
    %100 = vector.load %arg5[%c0_33, %c0_34] : memref<1x32xf32, #tpu.memory_space<vmem>>, vector<1x32xf32>
    %101 = vector.broadcast %100 : vector<1x32xf32> to vector<16x32xf32>
    %102 = arith.addf %99, %101 : vector<16x32xf32>
    %103 = vector.shape_cast %102 : vector<16x32xf32> to vector<1x16x32xf32>
    %c0_35 = arith.constant 0 : index
    %c0_36 = arith.constant 0 : index
    %c0_37 = arith.constant 0 : index
    %104 = vector.load %arg6[%c0_35, %c0_36, %c0_37] : memref<1x16x32xf32, #tpu.memory_space<vmem>>, vector<1x16x32xf32>
    tpu.vector_store %arg6[%c0_35, %c0_36, %c0_37], %103 {strides = array<i32>} : memref<1x16x32xf32, #tpu.memory_space<vmem>>, vector<1x16x32xf32>,
    return
  }
  func.func @transform_0(%arg0: i32) -> (i32, i32, i32) {
    %c0_i32 = arith.constant 0 : i32
    %c0_i32_0 = arith.constant 0 : i32
    %c0_i32_1 = arith.constant 0 : i32
    return %arg0, %c0_i32, %c0_i32_0 : i32, i32, i32
  }
  func.func @transform_1(%arg0: i32) -> (i32, i32) {
    %c0_i32 = arith.constant 0 : i32
    %c0_i32_0 = arith.constant 0 : i32
    %c0_i32_1 = arith.constant 0 : i32
    return %c0_i32, %c0_i32_0 : i32, i32
  }
  func.func @transform_2(%arg0: i32) -> (i32, i32) {
    %c0_i32 = arith.constant 0 : i32
    %c0_i32_0 = arith.constant 0 : i32
    %c0_i32_1 = arith.constant 0 : i32
    return %c0_i32, %c0_i32_0 : i32, i32
  }
  func.func @transform_3(%arg0: i32) -> (i32, i32) {
    %c0_i32 = arith.constant 0 : i32
    %c0_i32_0 = arith.constant 0 : i32
    %c0_i32_1 = arith.constant 0 : i32
    return %c0_i32, %c0_i32_0 : i32, i32
  }
  func.func @transform_4(%arg0: i32) -> (i32, i32) {
    %c0_i32 = arith.constant 0 : i32
    %c0_i32_0 = arith.constant 0 : i32
    %c0_i32_1 = arith.constant 0 : i32
    return %c0_i32, %c0_i32_0 : i32, i32
  }
  func.func @transform_5(%arg0: i32) -> (i32, i32, i32) {
    %c0_i32 = arith.constant 0 : i32
    %c0_i32_0 = arith.constant 0 : i32
    %c0_i32_1 = arith.constant 0 : i32
    return %arg0, %c0_i32, %c0_i32_0 : i32, i32, i32
  }
}

</mosaic_0001>

<bundles_post_ra>
// kernel: tpu_custom_call.1
= control target key start
LH: loop header
LB: loop body
LE: loop exit
PB: predicated region body
PF: predicated region fallthrough
CT: control target
= control target key end

     0   :  { %10 = vsyncpa [#allocation5], 0  ;;  %s1826_s0 = inlined_call_operand.hbm [shape: f32[2,16,32], index: 0, kind: input, shape index: {}]   ;;  %s1827_s1 = inlined_call_operand.hbm [shape: bf16[32,96], index: 1, kind: input, shape index: {}]   ;;  %s1828_s2 = inlined_call_operand.vmem [shape: f32[1,96], index: 2, kind: input, shape index: {}]   ;;  %s1829_s3 = inlined_call_operand.hbm [shape: bf16[32,32], index: 3, kind: input, shape index: {}]   ;;  %s1830_s4 = inlined_call_operand.vmem [shape: f32[1,32], index: 4, kind: input, shape index: {}]   ;;  %s1831_s5 = inlined_call_operand.hbm [shape: f32[2,16,32], index: 5, kind: output, shape index: {}]  }
   0x1   :  { %12 = vsyncpa [#allocation5 + $0x1], 0 }
   0x2   :  { %13 = vsyncpa [#allocation8], 0 }
   0x3   :  { %14 = vsyncpa [#allocation6], 0 }
   0x4   :  { %16 = vsyncpa [#allocation6 + $0x1], 0  ;;  %s1491_s18 = smov 0   ;;  %s1493_s19 = smov 0  }
   0x5   :  { %s1495_s20 = smov 0   ;;  %s1497_s21 = smov 0  }
   0x6 LB: > { %s1512_s22 = sadd.s32 4294967295, %s1434_s21   ;;  %s1032_s23 = sadd.s32 4294967294, %s1434_s21   ;;  %s1434_s21 = sphi %s1497_s21, %s1851_s21   ;;  %s1430_s20 = sphi %s1495_s20, %s1850_s20   ;;  %s1426_s19 = sphi %s1493_s19, %s1849_s19   ;;  %s1422_s18 = sphi %s1491_s18, %s1848_s18  }
   0x7   : > { %p42_p0 = scmp.ne.s32.totalorder %s1426_s19, %s1422_s18  ;;  %p1832_p1 = scmp.eq.s32.totalorder %s1512_s22, 0 }
   0x8   : > { %p156_p3 = scmp.eq.s32.totalorder %s1032_s23, 1  ;;  %p1033_p5 = scmp.ge.s32.totalorder %s1434_s21, 1 }
   0x9   : > { %p1521_p4 = por %p1832_p1, %p42_p0  ;;  %p163_p7 = scmp.lt.s32.totalorder %s1434_s21, 3 }
   0xa   : > { %p1526_p6 = por %p156_p3, %p42_p0  ;;  %s1436_s27 = smov [#allocation7]  }
   0xb   : > { %s1835_s24 = scalar_select %p1521_p4, 1, 0 }
   0xc   : > { %s1836_s25 = scalar_select %p1526_p6, 1, 0 }
   0xd   : > { %p1531_p8 = pnand %p1033_p5, %p163_p7  ;;  %s175_s28 = sshll.u32 %s1436_s27, 4  ;;  %s1535_s28 = int_to_ptr.vmem [resolvable:$true] %s175_s28 }
   0xe   : > { %s1437_s30 = smov [#allocation9]   ;;  %s1278_s9 = scalar_lea.hbm %s1827_s1, 256 }
   0xf   : > { %p1166_p9 = pneg %p1531_p8  ;;  %s191_s6 = sshll.u32 %s1437_s30, 4  ;;  %s1546_s6 = int_to_ptr.vmem [resolvable:$true] %s191_s6 }
  0x10   : > { %p1279_p12 = scmp.ne.s32.totalorder %s1827_s1, %s1278_s9  ;;  %p1285_p5 = scmp.lt.u32.totalorder %s1278_s9, %s1827_s1 }
  0x11   : > { %p1542_p11 = pnand %p1166_p9, %p1832_p1 }
  0x13   : > { %p1280_p13 = pneg %p1542_p11 }
  0x15   : > { %p1281_p0 = pnand %p1280_p13, %p1279_p12 }
  0x17   : > { %p1282_p3 = pneg %p1281_p0 }
  0x19   : > { %p1287_p7 = pnand %p1285_p5, %p1282_p3 }
  0x1b   : > { %1290 = shalt.err (!%p1287_p7)
}
  0x1c   : > { %s1291_s14 = scalar_lea.vmem %s1535_s28, 256  ;;  %p1299_p2 = scmp.lt.s32.totalorder %s1535_s28, %s1535_s28 }
  0x1d   : > { %p1292_p9 = scmp.ne.s32.totalorder %s1535_s28, %s1291_s14  ;;  %p1300_p12 = scmp.lt.s32.totalorder %s1291_s14, %s1291_s14 }
  0x1f   : > { %p1294_p10 = pnand %p1292_p9, %p1280_p13  ;;  %p1301_p0 = por %p1300_p12, %p1299_p2 }
  0x21   : > { %p1295_p1 = pneg %p1294_p10 }
  0x23   : > { %p1302_p6 = pnand %p1301_p0, %p1295_p1 }
  0x25   : > { %1305 = shalt.err (!%p1302_p6)
}
  0x26   : > { %s1438_s15 = smov 64   ;;  %s1439_s16 = smov 4  }
  0x27   : > { %1169 = dma.hbm_to_vmem [thread:$0]  (!%p1542_p11), %s1827_s1, 256, %s1535_s28, [#allocation8], %s1438_s15, %s1438_s15, %s1439_s16  }
  0x28   : > { %s1306_s7 = scalar_lea.hbm %s1829_s3, 256 }
  0x29   : > { %p1307_p2 = scmp.ne.s32.totalorder %s1829_s3, %s1306_s7  ;;  %p1313_p10 = scmp.lt.u32.totalorder %s1306_s7, %s1829_s3 }
  0x2b   : > { %p1309_p1 = pnand %p1307_p2, %p1280_p13 }
  0x2d   : > { %p1310_p6 = pneg %p1309_p1 }
  0x2f   : > { %p1315_p3 = pnand %p1313_p10, %p1310_p6 }
  0x31   : > { %1318 = shalt.err (!%p1315_p3)
}
  0x32   : > { %s1319_s28 = scalar_lea.vmem %s1546_s6, 256  ;;  %p1327_p12 = scmp.lt.s32.totalorder %s1546_s6, %s1546_s6 }
  0x33   : > { %p1320_p5 = scmp.ne.s32.totalorder %s1546_s6, %s1319_s28  ;;  %p1328_p0 = scmp.lt.s32.totalorder %s1319_s28, %s1319_s28 }
  0x35   : > { %p1322_p7 = pnand %p1320_p5, %p1280_p13  ;;  %p1329_p2 = por %p1328_p0, %p1327_p12 }
  0x37   : > { %p1323_p9 = pneg %p1322_p7 }
  0x39   : > { %p1330_p1 = pnand %p1329_p2, %p1323_p9 }
  0x3b   : > { %1333 = shalt.err (!%p1330_p1)
}
  0x3c   : > { %1172 = dma.hbm_to_vmem [thread:$0]  (!%p1542_p11), %s1829_s3, 256, %s1546_s6, [#allocation8], %s1438_s15, %s1438_s15, %s1439_s16  }
  0x3d   : > { %s1601_s14 = sadd.s32 1, %s1434_s21   ;;  %s29_s29 = sadd.s32 1, %s1430_s20 }
  0x3e   : > { %s26_s17 = ssub.s32 %s1434_s21, %s1601_s14  ;;  %p36_p13 = scmp.ne.s32.totalorder %s1430_s20, %s1426_s19 }
  0x3f   : > { %p27_p6 = scmp.eq.s32.totalorder %s26_s17, 0  ;;  %p37_p10 = scmp.eq.s32.totalorder %s1434_s21, 0 }
  0x40   : > { %p1839_p3 = scmp.eq.s32.totalorder %s1512_s22, 1  ;;  %p1183_p7 = scmp.lt.s32.totalorder %s1434_s21, 2 }
  0x41   : > { %s1617_s27 = scalar_select %p27_p6, %s1430_s20, %s29_s29  }
  0x42   : > { %p1611_p5 = por %p1839_p3, %p36_p13  ;;  %p38_p9 = por %p37_p10, %p36_p13 }
  0x43   : > { %s208_s30 = sand.u32 1, %s1430_s20   ;;  %s1066_s6 = sshll.u32 %s1434_s21, 8 }
  0x44   : > { %s1840_s23 = scalar_select %p1611_p5, 1, 0 }
  0x45   : > { %s1037_s7 = sshll.u32 %s208_s30, 4  ;;  %s1624_s8 = scalar_lea.hbm %s1826_s0, %s1066_s6 }
  0x46   : > { %s212_s9 = scalar_lea.vmem [#allocation4], %s1037_s7  ;;  %p1628_p11 = pnand %p1183_p7, %p38_p9 }
  0x47   : > { %s219_s10 = sshll.u32 %s212_s9, 4  ;;  %s1632_s28 = scalar_lea.sflag [#allocation5], %s208_s30  ;;  %s1626_s10 = int_to_ptr.vmem [resolvable:$true] %s219_s10 }
  0x48   : > { %s1334_s12 = scalar_lea.hbm %s1624_s8, 256  ;;  %p1336_p0 = pneg %p1628_p11 }
  0x49   : > { %p1335_p12 = scmp.ne.s32.totalorder %s1624_s8, %s1334_s12  ;;  %s1339_s17 = scalar_lea.hbm %s1826_s0, 512 }
  0x4a   : > { %p1340_p13 = scmp.lt.u32.totalorder %s1624_s8, %s1826_s0  ;;  %p1341_p6 = scmp.lt.u32.totalorder %s1339_s17, %s1334_s12 }
  0x4b   : > { %p1337_p2 = pnand %p1336_p0, %p1335_p12  ;;  %p1343_p3 = scmp.lt.u32.totalorder %s1334_s12, %s1624_s8 }
  0x4c   : > { %p1342_p10 = por %p1341_p6, %p1340_p13 }
  0x4d   : > { %p1338_p1 = pneg %p1337_p2 }
  0x4e   : > { %p1344_p7 = por %p1343_p3, %p1342_p10 }
  0x50   : > { %p1345_p9 = pnand %p1344_p7, %p1338_p1 }
  0x52   : > { %1348 = shalt.err (!%p1345_p9)
}
  0x53   : > { %s1349_s30 = scalar_lea.vmem %s1626_s10, 256  ;;  %s1440_s15 = smov [#allocation4]  }
  0x54   : > { %p1350_p12 = scmp.ne.s32.totalorder %s1626_s10, %s1349_s30  ;;  %s1354_s16 = sshll.u32 %s1440_s15, 4  ;;  %s1355_s16 = int_to_ptr.vmem [resolvable:$false] %s1354_s16 }
  0x55   : > { %s1356_s9 = scalar_lea.vmem %s1355_s16, 512  ;;  %p1357_p4 = scmp.lt.s32.totalorder %s1626_s10, %s1355_s16 }
  0x56   : > { %p1352_p2 = pnand %p1350_p12, %p1336_p0  ;;  %p1358_p13 = scmp.lt.s32.totalorder %s1356_s9, %s1349_s30 }
  0x58   : > { %p1353_p5 = pneg %p1352_p2  ;;  %p1359_p6 = por %p1358_p13, %p1357_p4 }
  0x5a   : > { %p1360_p10 = pnand %p1359_p6, %p1353_p5 }
  0x5c   : > { %1363 = shalt.err (!%p1360_p10)
}
  0x5d   : > { %s1441_s12 = smov 128   ;;  %s1442_s13 = smov 8  }
  0x5e   : > { %1176 = dma.hbm_to_vmem [thread:$0]  (!%p1628_p11), %s1624_s8, 256, %s1626_s10, %s1632_s28, %s1441_s12, %s1441_s12, %s1442_s13  }
  0x5f   : > { %231 = sbr.rel (%p1531_p8) target bundleno = 1635 (0x663), region = 40  ;;  %s1663_s29 = sand.u32 (!%p1531_p8), 1, %s1426_s19  }
  0x60   : > { %s1041_s17 = sshll.u32 (!%p1531_p8), %s1663_s29, 4  ;;  %s234_s7 = scalar_lea.sflag (!%p1531_p8), [#allocation5], %s1663_s29 }
  0x61   : > { %s237_s6 = scalar_lea.vmem (!%p1531_p8), [#allocation4], %s1041_s17  ;;  %p1842_p4 = scmp.ne.s32.totalorder (!%p1531_p8), %s1835_s24, 0 }
  0x66   : > { %1409 = dma.done.wait (%p1842_p4), %s234_s7, 256  }
  0x67   : > { %1411 = vsyncadd (%p1842_p4), %s234_s7, 4294967040  ;;  %p1843_p5 = scmp.eq.s32.totalorder %s1512_s22, 0 }
  0x69   : > { %1413 = dma.done.wait (%p1843_p5), [#allocation8], 512   ;;  %p1844_p8 = pmov %p1843_p5 }
  0x6a   : > { %v1443_v0 = vmov 0.0   ;;  %vm1444_vm0 = vmmov 0   ;;  %v1242_v1 = vld [vmem:[#allocation7] sm:$0xff]   ;;  %v1243_v2 = vld [vmem:[#allocation7 + $0x8] sm:$0xff]   ;;  %vm299_vm1 = vcmask 261120   ;;  %vm345_vm2 = vcmask 785408  }
  0x6b   : > { %1415 = vsyncadd (%p1844_p8), [#allocation8], 4294966784  ;;  %1090 = vmatprep.subr.bf16.mxu0 %v1443_v0  ;;  %1094 = vmatprep.mubr.msk.bf16.mxu0 %vm1444_vm0, %v1443_v0  ;;  %v273_v3 = vld [vmem:[%s237_s6] sm:$0xff]  ;;  %v274_v4 = vld [vmem:[%s237_s6 + $0x8] sm:$0xff]  ;;  %s1445_s8 = smov 120   ;;  %s1446_s10 = smov 96  }
  0x6c   : > { %1098 = vmatprep.subr.bf16.mxu1 %v1443_v0  ;;  %1100 = vmatprep.mubr.msk.bf16.mxu1 %vm1444_vm0, %v1443_v0  ;;  %v275_v5 = vpack.c.bf16 %v274_v4, %v273_v3  ;;  %v1045_v6 = vld [vmem:[%s1828_s2] ss:$0 sm:$0xff]  ;;  %s1447_s11 = smov 80   ;;  %s1448_s28 = smov 88   ;;  %vm351_vm3 = vcmask 64512   ;;  %vm399_vm4 = vcmask 130048  }
  0x6d   : > { %1091 = vmatpush3.bf16.msra.mxu0 %v1242_v1  ;;  %s1449_s30 = smov 72   ;;  %s1450_s15 = smov 112   ;;  %vm851_vm5 = vcmask 195584  }
  0x6e   : > { %1092 = vmatprep.subr.bf16.mxu0 %v1443_v0  ;;  %s1451_s16 = smov 104   ;;  %s1452_s9 = smov 56  }
  0x6f   : > { %s1453_s12 = smov 64   ;;  %s1454_s13 = smov 48  }
  0x70   : > { %s1455_s7 = smov 40   ;;  %s1456_s6 = smov 8  }
  0x71   : > { %1093 = vmatpush3.bf16.msra.mxu0 %v1243_v2  ;;  %s1457_s24 = smov 16   ;;  %s1458_s26 = smov 24  }
  0x72   : > { %1104 = vmatprep.subr.bf16.mxu0 %v1443_v0  ;;  %p1845_p0 = scmp.ne.s32.totalorder %s1840_s23, 0 }
  0x74   : > { %1095 = vmatmul.mubr.msk.bf16.vlgmr.msra.gmra.mrb[0].mxu0 %vm299_vm1, %v275_v5 }
  0x75   : > { %1106 = vmatprep.mubr.msk.bf16.mxu0 %vm1444_vm0, %v1443_v0 }
 0x147   : > { %v337_v7 = vpop.f32.mrb[0].mxu0 }
 0x148   : > { %v1096_v8 = vpop.f32.mrb[1].mxu0  ;;  %v338_v10 = vadd.f32 %v1045_v6, %v337_v7 }
 0x149   : > { %v340_v9 = vpop.f32.mrb[2].mxu0 }
 0x14a   : > { %v341_v11 = vadd.f32 %v1045_v6, %v340_v9  ;;  %v1097_v12 = vpop.f32.mrb[3].mxu0 }
 0x14c   : > { %v344_v13 = vpack.c.bf16 %v341_v11, %v338_v10 }
 0x14e   : > { %346 = vst.msk [vmem:[#allocation2] sm:$0xff] %vm345_vm2, %v344_v13 }
 0x155   : > { %v1691_v14 = vld [vmem:[#allocation2] sm:$0xff] }
 0x156   : > { %471 = vrot.lane.b32.xlu1 %v1691_v14, %s1445_s8  ;;  %349 = vrot.lane.b32.xlu0 %v1691_v14, %s1446_s10 }
 0x15a   : > { %595 = vrot.lane.b32.xlu1 %v1691_v14, %s1447_s11  ;;  %473 = vrot.lane.b32.xlu0 %v1691_v14, %s1448_s28  ;;  %s271_s11 = scalar_lea.vmem [#allocation10], %s1041_s17 }
 0x15b   : > { %s940_s28 = sshll.u32 %s271_s11, 4  ;;  %s1774_s28 = int_to_ptr.vmem [resolvable:$true] %s940_s28 }
 0x15e   : > { %717 = vrot.lane.b32.xlu1 %v1691_v14, %s1449_s30  ;;  %593 = vrot.lane.b32.xlu0 %v1691_v14, %s1450_s15  ;;  %s1067_s30 = sshll.u32 %s1512_s22, 8  ;;  %s927_s22 = scalar_lea.sflag [#allocation6], %s1663_s29 }
 0x15f   : > { %s1780_s17 = scalar_lea.hbm %s1831_s5, %s1067_s30 }
 0x162   : > { %715 = vrot.lane.b32.xlu0 %v1691_v14, %s1451_s16 }
 0x1c8   : > { %v350_v15 = vpop.permute.xlu0 %349  ;;  %v472_v18 = vpop.permute.xlu1 %471 }
 0x1c9   : > { %v356_v16 = vsel %vm351_vm3, %v350_v15, 0 }
 0x1ca   : > { %1099 = vmatpush3.bf16.xpose.msra.mxu1 %v356_v16 }
 0x1cb   : > { %1110 = vmatprep.subr.bf16.mxu1 %v1443_v0 }
 0x1cc   : > { %v474_v17 = vpop.permute.xlu0 %473  ;;  %v596_v20 = vpop.permute.xlu1 %595 }
 0x1cd   : > { %v479_v19 = vsel %vm351_vm3, %v474_v17, 0  ;;  %v601_v21 = vsel %vm351_vm3, %v596_v20, 0 }
 0x1d0   : > { %v718_v22 = vpop.permute.xlu1 %717  ;;  %v594_v23 = vpop.permute.xlu0 %593 }
 0x1d1   : > { %1101 = vmatmul.mubr.msk.bf16.vlgmr.msra.gmra.mrb[0].mxu1 %vm351_vm3, %v1691_v14  ;;  %v723_v24 = vsel %vm351_vm3, %v718_v22, 0 }
 0x1d2   : > { %1111 = vmatpush3.bf16.xpose.msra.mxu1 %v479_v19  ;;  %1112 = vmatprep.mubr.msk.bf16.mxu1 %vm1444_vm0, %v1443_v0 }
 0x1d3   : > { %1122 = vmatprep.subr.bf16.mxu1 %v1443_v0 }
 0x1d4   : > { %v716_v25 = vpop.permute.xlu0 %715 }
 0x1d9   : > { %1113 = vmatmul.mubr.msk.bf16.vlgmr.msra.gmra.mrb[4].mxu1 %vm351_vm3, %v472_v18 }
 0x1da   : > { %1123 = vmatpush3.bf16.xpose.msra.mxu1 %v601_v21  ;;  %1124 = vmatprep.mubr.msk.bf16.mxu1 %vm1444_vm0, %v1443_v0 }
 0x1db   : > { %1134 = vmatprep.subr.bf16.mxu1 %v1443_v0 }
 0x1e1   : > { %1125 = vmatmul.mubr.msk.bf16.vlgmr.msra.gmra.mrb[8].mxu1 %vm351_vm3, %v594_v23 }
 0x1e2   : > { %1135 = vmatpush3.bf16.xpose.msra.mxu1 %v723_v24  ;;  %1136 = vmatprep.mubr.msk.bf16.mxu1 %vm1444_vm0, %v1443_v0 }
 0x1e3   : > { %1146 = vmatprep.subr.bf16.mxu1 %v1443_v0 }
 0x1e9   : > { %1137 = vmatmul.mubr.msk.bf16.vlgmr.msra.gmra.mrb[12].mxu1 %vm351_vm3, %v716_v25 }
 0x1ea   : > { %1150 = vmatprep.mubr.msk.bf16.mxu1 %vm1444_vm0, %v1443_v0 }
 0x2a4   : > { %v392_v26 = vpop.f32.mrb[0].mxu1 }
 0x2a5   : > { %v1102_v27 = vpop.f32.mrb[1].mxu1  ;;  %v400_v28 = vsel %vm399_vm4, %v392_v26, -inf }
 0x2a6   : > { %401 = vmax.xlane.f32.xlu1 %v400_v28  ;;  %v395_v29 = vpop.f32.mrb[2].mxu1 }
 0x2a7   : > { %v1103_v30 = vpop.f32.mrb[3].mxu1  ;;  %v403_v31 = vsel %vm399_vm4, %v395_v29, -inf }
 0x2a8   : > { %404 = vmax.xlane.f32.xlu0 %v403_v31 }
 0x2ac   : > { %v515_v32 = vpop.f32.mrb[4].mxu1 }
 0x2ad   : > { %v1114_v33 = vpop.f32.mrb[5].mxu1  ;;  %v522_v34 = vsel %vm399_vm4, %v515_v32, -inf }
 0x2ae   : > { %523 = vmax.xlane.f32.xlu0 %v522_v34  ;;  %v518_v35 = vpop.f32.mrb[6].mxu1 }
 0x2af   : > { %v1115_v36 = vpop.f32.mrb[7].mxu1  ;;  %v525_v37 = vsel %vm399_vm4, %v518_v35, -inf }
 0x2b0   : > { %526 = vmax.xlane.f32.xlu1 %v525_v37 }
 0x2b4   : > { %v637_v38 = vpop.f32.mrb[8].mxu1 }
 0x2b5   : > { %v1126_v39 = vpop.f32.mrb[9].mxu1  ;;  %v644_v40 = vsel %vm399_vm4, %v637_v38, -inf }
 0x2b6   : > { %645 = vmax.xlane.f32.xlu0 %v644_v40  ;;  %v640_v41 = vpop.f32.mrb[10].mxu1 }
 0x2b7   : > { %v1127_v42 = vpop.f32.mrb[11].mxu1  ;;  %v647_v43 = vsel %vm399_vm4, %v640_v41, -inf }
 0x2b8   : > { %648 = vmax.xlane.f32.xlu1 %v647_v43 }
 0x2bc   : > { %v759_v44 = vpop.f32.mrb[12].mxu1 }
 0x2bd   : > { %v1138_v45 = vpop.f32.mrb[13].mxu1  ;;  %v766_v46 = vsel %vm399_vm4, %v759_v44, -inf }
 0x2be   : > { %767 = vmax.xlane.f32.xlu0 %v766_v46  ;;  %v762_v47 = vpop.f32.mrb[14].mxu1 }
 0x2bf   : > { %v1139_v48 = vpop.f32.mrb[15].mxu1  ;;  %v769_v49 = vsel %vm399_vm4, %v762_v47, -inf }
 0x2c0   : > { %770 = vmax.xlane.f32.xlu1 %v769_v49 }
 0x333   : > { %v402_v50 = vpop.xlane.xlu1 %401 }
 0x334   : > { %v406_v51 = vsub.f32 %v392_v26, %v402_v50 }
 0x335   : > { %v405_v52 = vpop.xlane.xlu0 %404 }
 0x336   : > { %v408_v53 = vmul.f32 1.442695, %v406_v51  ;;  %v407_v54 = vsub.f32 %v395_v29, %v405_v52 }
 0x338   : > { %1246 = vpow2.f32 %v408_v53  ;;  %v410_v55 = vmul.f32 1.442695, %v407_v54 }
 0x33a   : > { %1248 = vpow2.f32 %v410_v55 }
 0x33b   : > { %v524_v56 = vpop.xlane.xlu0 %523 }
 0x33c   : > { %v528_v57 = vsub.f32 %v515_v32, %v524_v56 }
 0x33d   : > { %v527_v2 = vpop.xlane.xlu1 %526 }
 0x33e   : > { %v530_v58 = vmul.f32 1.442695, %v528_v57  ;;  %v529_v3 = vsub.f32 %v518_v35, %v527_v2 }
 0x340   : > { %1250 = vpow2.f32 %v530_v58  ;;  %v532_v6 = vmul.f32 1.442695, %v529_v3 }
 0x342   : > { %v1247_v59 = vpop.eup %1246  ;;  %1252 = vpow2.f32 %v532_v6 }
 0x343   : > { %v412_v60 = vsel %vm399_vm4, %v1247_v59, 0.0  ;;  %v646_v5 = vpop.xlane.xlu0 %645 }
 0x344   : > { %v1249_v61 = vpop.eup %1248  ;;  %413 = vadd.xlane.f32.xlu0 %v412_v60  ;;  %v650_v9 = vsub.f32 %v637_v38, %v646_v5 }
 0x345   : > { %v415_v62 = vsel %vm399_vm4, %v1249_v61, 0.0  ;;  %v649_v4 = vpop.xlane.xlu1 %648 }
 0x346   : > { %416 = vadd.xlane.f32.xlu1 %v415_v62  ;;  %v651_v7 = vsub.f32 %v640_v41, %v649_v4  ;;  %v652_v13 = vmul.f32 1.442695, %v650_v9 }
 0x348   : > { %v654_v11 = vmul.f32 1.442695, %v651_v7 }
 0x34a   : > { %v1731_v63 = vpop.eup %1250  ;;  %1254 = vpow2.f32 %v654_v11 }
 0x34b   : > { %v534_v1 = vsel %vm399_vm4, %v1731_v63, 0.0  ;;  %v768_v10 = vpop.xlane.xlu0 %767  ;;  %1256 = vpow2.f32 %v652_v13 }
 0x34c   : > { %535 = vadd.xlane.f32.xlu0 %v534_v1  ;;  %v772_v15 = vsub.f32 %v759_v44, %v768_v10  ;;  %v1253_v18 = vpop.eup %1252 }
 0x34d   : > { %v771_v8 = vpop.xlane.xlu1 %770  ;;  %v537_v19 = vsel %vm399_vm4, %v1253_v18, 0.0 }
 0x34e   : > { %v773_v12 = vsub.f32 %v762_v47, %v771_v8  ;;  %v774_v17 = vmul.f32 1.442695, %v772_v15  ;;  %v1244_v8 = vld [vmem:[#allocation9] sm:$0xff]  }
 0x34f   : > { %1147 = vmatpush3.bf16.msra.mxu1 %v1244_v8 }
 0x350   : > { %v776_v16 = vmul.f32 1.442695, %v773_v12  ;;  %v1245_v12 = vld [vmem:[#allocation9 + $0x8] sm:$0xff]   ;;  %1148 = vmatprep.subr.bf16.mxu1 %v1443_v0 }
 0x352   : > { %1258 = vpow2.f32 %v776_v16 }
 0x353   : > { %1260 = vpow2.f32 %v774_v17  ;;  %1149 = vmatpush3.bf16.msra.mxu1 %v1245_v12 }
 0x354   : > { %v1255_v20 = vpop.eup %1254 }
 0x355   : > { %v1257_v21 = vpop.eup %1256  ;;  %v659_v22 = vsel %vm399_vm4, %v1255_v20, 0.0 }
 0x356   : > { %v656_v24 = vsel %vm399_vm4, %v1257_v21, 0.0 }
 0x357   : > { %545 = vrot.lane.b32.xlu1 %v1691_v14, %s1452_s9  ;;  %s1364_s9 = scalar_lea.vmem %s1774_s28, 256 }
 0x358   : > { %p1365_p11 = scmp.ne.s32.totalorder %s1774_s28, %s1364_s9 }
 0x35a   : > { %p1366_p1 = pnand %p1365_p11, %p1845_p0 }
 0x35c   : > { %v1739_v23 = vpop.eup %1258  ;;  %p1367_p3 = pneg %p1366_p1 }
 0x35d   : > { %v1261_v25 = vpop.eup %1260  ;;  %v781_v26 = vsel %vm399_vm4, %v1739_v23, 0.0 }
 0x35e   : > { %v778_v27 = vsel %vm399_vm4, %v1261_v25, 0.0 }
 0x362   : > { %423 = vrot.lane.b32.xlu0 %v1691_v14, %s1453_s12  ;;  %s1459_s12 = smov [#allocation10]  }
 0x37b   : > { %538 = vadd.xlane.f32.xlu1 %v537_v19 }
 0x37f   : > { %660 = vadd.xlane.f32.xlu1 %v659_v22 }
 0x381   : > { %657 = vadd.xlane.f32.xlu0 %v656_v24 }
 0x383   : > { %782 = vadd.xlane.f32.xlu1 %v781_v26 }
 0x385   : > { %779 = vadd.xlane.f32.xlu0 %v778_v27 }
 0x394   : > { %667 = vrot.lane.b32.xlu1 %v1691_v14, %s1454_s13  ;;  %s1368_s13 = sshll.u32 %s1459_s12, 4  ;;  %s1369_s13 = int_to_ptr.vmem [resolvable:$false] %s1368_s13 }
 0x395   : > { %p1371_p7 = scmp.lt.s32.totalorder %s1774_s28, %s1369_s13 }
 0x39b   : > { %789 = vrot.lane.b32.xlu0 %v1691_v14, %s1455_s7  ;;  %s1370_s7 = scalar_lea.vmem %s1369_s13, 512 }
 0x39c   : > { %p1372_p9 = scmp.lt.s32.totalorder %s1370_s7, %s1364_s9 }
 0x39e   : > { %p1373_p12 = por %p1372_p9, %p1371_p7 }
 0x3a0   : > { %p1374_p2 = pnand %p1373_p12, %p1367_p3 }
 0x3d1   : > { %v414_v28 = vpop.xlane.xlu0 %413 }
 0x3d2   : > { %1262 = vrcp.f32 %v414_v28 }
 0x3d3   : > { %v417_v29 = vpop.xlane.xlu1 %416 }
 0x3d4   : > { %1264 = vrcp.f32 %v417_v29 }
 0x3d7   : > { %v546_v37 = vpop.permute.xlu1 %545 }
 0x3d9   : > { %v536_v30 = vpop.xlane.xlu0 %535 }
 0x3da   : > { %1266 = vrcp.f32 %v536_v30 }
 0x3dc   : > { %v1263_v31 = vpop.eup %1262 }
 0x3dd   : > { %v424_v32 = vpop.permute.xlu0 %423  ;;  %v420_v34 = vmul.f32 %v1263_v31, %v1247_v59 }
 0x3de   : > { %v1265_v33 = vpop.eup %1264  ;;  %1105 = vmatpush3.bf16.msra.mxu0 %v424_v32 }
 0x3df   : > { %v421_v35 = vmul.f32 %v1265_v33, %v1249_v61  ;;  %1116 = vmatprep.subr.bf16.mxu0 %v1443_v0 }
 0x3e1   : > { %v422_v36 = vpack.c.bf16 %v421_v35, %v420_v34 }
 0x3e3   : > { %1107 = vmatmul.mubr.msk.bf16.vlgmr.msra.gmra.mrb[4].mxu0 %vm399_vm4, %v422_v36 }
 0x3e4   : > { %1117 = vmatpush3.bf16.msra.mxu0 %v546_v37  ;;  %1118 = vmatprep.mubr.msk.bf16.mxu0 %vm1444_vm0, %v1443_v0  ;;  %v1267_v40 = vpop.eup %1266 }
 0x3e5   : > { %1128 = vmatprep.subr.bf16.mxu0 %v1443_v0  ;;  %v542_v44 = vmul.f32 %v1267_v40, %v1731_v63 }
 0x408   : > { %v539_v14 = vpop.xlane.xlu1 %538 }
 0x409   : > { %1268 = vrcp.f32 %v539_v14 }
 0x40c   : > { %v661_v38 = vpop.xlane.xlu1 %660 }
 0x40d   : > { %1270 = vrcp.f32 %v661_v38 }
 0x40e   : > { %v658_v39 = vpop.xlane.xlu0 %657 }
 0x40f   : > { %1272 = vrcp.f32 %v658_v39 }
 0x410   : > { %v783_v41 = vpop.xlane.xlu1 %782 }
 0x412   : > { %v780_v42 = vpop.xlane.xlu0 %779 }
 0x413   : > { %v1269_v43 = vpop.eup %1268  ;;  %1274 = vrcp.f32 %v780_v42 }
 0x414   : > { %v543_v45 = vmul.f32 %v1269_v43, %v1253_v18  ;;  %1276 = vrcp.f32 %v783_v41  ;;  %v668_v48 = vpop.permute.xlu1 %667 }
 0x416   : > { %v544_v46 = vpack.c.bf16 %v543_v45, %v542_v44  ;;  %v790_v54 = vpop.permute.xlu0 %789 }
 0x417   : > { %v1271_v47 = vpop.eup %1270 }
 0x418   : > { %1119 = vmatmul.mubr.msk.bf16.vlgmr.msra.gmra.mrb[8].mxu0 %vm399_vm4, %v544_v46  ;;  %v665_v51 = vmul.f32 %v1271_v47, %v1255_v20 }
 0x419   : > { %v1273_v49 = vpop.eup %1272  ;;  %1129 = vmatpush3.bf16.msra.mxu0 %v668_v48  ;;  %1130 = vmatprep.mubr.msk.bf16.mxu0 %vm1444_vm0, %v1443_v0 }
 0x41a   : > { %v664_v50 = vmul.f32 %v1273_v49, %v1257_v21  ;;  %1140 = vmatprep.subr.bf16.mxu0 %v1443_v0 }
 0x41c   : > { %v666_v52 = vpack.c.bf16 %v665_v51, %v664_v50 }
 0x41d   : > { %v1275_v53 = vpop.eup %1274 }
 0x41e   : > { %v1277_v55 = vpop.eup %1276  ;;  %v786_v56 = vmul.f32 %v1275_v53, %v1261_v25  ;;  %v1057_v25 = vld [vmem:[%s1830_s4] ss:$0 sm:$0xff] }
 0x41f   : > { %v787_v57 = vmul.f32 %v1277_v55, %v1739_v23 }
 0x420   : > { %1131 = vmatmul.mubr.msk.bf16.vlgmr.msra.gmra.mrb[12].mxu0 %vm399_vm4, %v666_v52 }
 0x421   : > { %1141 = vmatpush3.bf16.msra.mxu0 %v790_v54  ;;  %1142 = vmatprep.mubr.msk.bf16.mxu0 %vm1444_vm0, %v1443_v0  ;;  %v788_v58 = vpack.c.bf16 %v787_v57, %v786_v56 }
 0x428   : > { %1143 = vmatmul.mubr.msk.bf16.vlgmr.msra.gmra.mrb[16].mxu0 %vm399_vm4, %v788_v58 }
 0x4b6   : > { %v463_v59 = vpop.f32.mrb[4].mxu0 }
 0x4b7   : > { %v1108_v60 = vpop.f32.mrb[5].mxu0 }
 0x4b8   : > { %v466_v61 = vpop.f32.mrb[6].mxu0 }
 0x4b9   : > { %v470_v62 = vpack.c.bf16 %v466_v61, %v463_v59  ;;  %v1109_v63 = vpop.f32.mrb[7].mxu0 }
 0x4eb   : > { %v585_v1 = vpop.f32.mrb[8].mxu0 }
 0x4ec   : > { %v1120_v2 = vpop.f32.mrb[9].mxu0 }
 0x4ed   : > { %v588_v3 = vpop.f32.mrb[10].mxu0 }
 0x4ee   : > { %v592_v4 = vpack.c.bf16 %v588_v3, %v585_v1  ;;  %v1121_v5 = vpop.f32.mrb[11].mxu0 }
 0x4f0   : > { %838 = vrot.lane.b32.xlu1 %v592_v4, %s1456_s6 }
 0x4f3   : > { %v707_v6 = vpop.f32.mrb[12].mxu0 }
 0x4f4   : > { %v1132_v7 = vpop.f32.mrb[13].mxu0 }
 0x4f5   : > { %v710_v9 = vpop.f32.mrb[14].mxu0 }
 0x4f6   : > { %v714_v10 = vpack.c.bf16 %v710_v9, %v707_v6  ;;  %v1133_v11 = vpop.f32.mrb[15].mxu0 }
 0x4f8   : > { %841 = vrot.lane.b32.xlu0 %v714_v10, %s1457_s24 }
 0x4fb   : > { %v829_v13 = vpop.f32.mrb[16].mxu0 }
 0x4fc   : > { %v1144_v15 = vpop.f32.mrb[17].mxu0 }
 0x4fd   : > { %v832_v16 = vpop.f32.mrb[18].mxu0 }
 0x4fe   : > { %v836_v17 = vpack.c.bf16 %v832_v16, %v829_v13  ;;  %v1145_v18 = vpop.f32.mrb[19].mxu0 }
 0x500   : > { %844 = vrot.lane.b32.xlu1 %v836_v17, %s1458_s26 }
 0x562   : > { %v839_v19 = vpop.permute.xlu1 %838 }
 0x563   : > { %v848_v21 = vsel %vm351_vm3, %v470_v62, %v839_v19 }
 0x56a   : > { %v842_v20 = vpop.permute.xlu0 %841 }
 0x56b   : > { %v850_v22 = vsel %vm399_vm4, %v848_v21, %v842_v20 }
 0x572   : > { %v845_v0 = vpop.permute.xlu1 %844 }
 0x573   : > { %v853_v23 = vsel %vm851_vm5, %v850_v22, %v845_v0 }
 0x574   : > { %855 = vst.msk [vmem:[#allocation3] sm:$0xff] %vm299_vm1, %v853_v23 }
 0x57b   : > { %v856_v24 = vld [vmem:[#allocation3] sm:$0xff] }
 0x57c   : > { %1151 = vmatmul.mubr.msk.bf16.vlgmr.msra.gmra.mrb[16].mxu1 %vm299_vm1, %v856_v24 }
 0x64f   : > { %v917_v26 = vpop.f32.mrb[16].mxu1 }
 0x650   : > { %v918_v27 = vadd.f32 %v1057_v25, %v917_v26  ;;  %v1152_v28 = vpop.f32.mrb[17].mxu1 }
 0x651   : > { %v920_v29 = vpop.f32.mrb[18].mxu1 }
 0x652   : > { %924 = vst.msk [vmem:[%s271_s11] sm:$0xff] %vm299_vm1, %v918_v27  ;;  %v921_v30 = vadd.f32 %v1057_v25, %v920_v29  ;;  %v1153_v31 = vpop.f32.mrb[19].mxu1 }
 0x654   : > { %925 = vst.msk [vmem:[%s271_s11 + $0x8] sm:$0xff] %vm299_vm1, %v921_v30 }
 0x655   : > { %1377 = shalt.err (!%p1374_p2)
}
 0x656   : > { %s1378_s24 = scalar_lea.hbm %s1780_s17, 256  ;;  %s1382_s10 = scalar_lea.hbm %s1831_s5, 512 }
 0x657   : > { %p1379_p13 = scmp.ne.s32.totalorder %s1780_s17, %s1378_s24  ;;  %p1383_p4 = scmp.lt.u32.totalorder %s1780_s17, %s1831_s5 }
 0x658   : > { %p1384_p5 = scmp.lt.u32.totalorder %s1382_s10, %s1378_s24  ;;  %p1386_p11 = scmp.lt.u32.totalorder %s1378_s24, %s1780_s17 }
 0x659   : > { %p1380_p6 = pnand %p1379_p13, %p1845_p0 }
 0x65a   : > { %p1385_p8 = por %p1384_p5, %p1383_p4 }
 0x65b   : > { %p1381_p10 = pneg %p1380_p6 }
 0x65c   : > { %p1387_p1 = por %p1386_p11, %p1385_p8 }
 0x65e   : > { %p1388_p3 = pnand %p1387_p1, %p1381_p10 }
 0x660   : > { %1391 = shalt.err (!%p1388_p3)
}
 0x661   : > { %s1460_s15 = smov 128  }
 0x662   : > { %1164 = dma.vmem_to_hbm [thread:$0]  (%p1845_p0), %s1774_s28, 256, %s1780_s17, %s927_s22, %s1460_s15, %s1460_s15, %s1456_s6  }
 0x663 PF: > { %s955_s16 = sand.u32 1, %s1422_s18   ;;  %p1846_p7 = scmp.ne.s32.totalorder %s1836_s25, 0 }
 0x664   : > { %p1847_p9 = scmp.ge.s32.totalorder %s1434_s21, 2  ;;  %s956_s9 = scalar_lea.sflag [#allocation6], %s955_s16 }
 0x666   : > { %p1178_p12 = pnand %p1847_p9, %p1846_p7 }
 0x668   : > { %1417 = dma.done.wait (!%p1178_p12), %s956_s9, 256  }
 0x669   : > { %1419 = vsyncadd (!%p1178_p12), %s956_s9, 4294967040  ;;  %p19_p2 = scmp.ge.s32.totalorder %s1601_s14, 4   ;;  %s1848_s18 = smov %s1426_s19 }
 0x66a   : > { %s1849_s19 = smov %s1430_s20  ;;  %s1850_s20 = smov %s1617_s27 }
 0x66b   : > { %s1851_s21 = smov %s1601_s14  ;;  %21 = sbr.rel (!%p19_p2) target bundleno = 6 (0x6), region = 93 }
 0x672   :  { %961 = vsyncpa [#allocation5], 1 }
 0x673   :  { %963 = vsyncpa [#allocation5 + $0x1], 1 }
 0x674   :  { %964 = vsyncpa [#allocation8], 1 }
 0x675   :  { %965 = vsyncpa [#allocation6], 1 }
 0x676   :  { %967 = vsyncpa [#allocation6 + $0x1], 1 }

</bundles_post_ra>
